<compile_context>
chip_gen: v7x
topology: tpu7x:2x2x1
jax: 0.10.0
libtpu: 0.0.40
codegen_flags: <defaults>
</compile_context>

<pallas_src>
import jax
import jax.numpy as jnp
from jax.experimental import pallas as pl
from jax.experimental.pallas import tpu as pltpu

INPLANES = 32          # model width D (self.inplanes)
BACKBONE_C = 2048      # resnet feature channels (folded away offline)
EMBED_D = 300          # word_encoder width (folded away offline)
VOCAB = 50             # stand-in vocab size
VOCAB_PAD = 128        # vocab head padded to one full 128-lane vreg row
PATCH = 4              # patchify stand-in kernel / stride


# --------------------------- Pallas kernels ---------------------------------

def _encoder_kernel(patch_ref, enc_w_ref, enc_b_ref, feat_ref):
    """Folded backbone + global avg-pool + encoder_layer: mean, one matmul."""
    mean_patch = jnp.mean(patch_ref[...], axis=1)                         # (B, P)
    feat_ref[...] = (jnp.dot(mean_patch, enc_w_ref[...],
                             preferred_element_type=jnp.float32)
                     + enc_b_ref[...])                                    # (B, D)


def _decoder_kernel(x_ref, lstm_w_ref, lstm_b_ref, wo_ref, bo_ref,
                    out_ref, h_sc, c_sc):
    """One decode token per grid step; h / c stay resident in VMEM scratch."""
    t = pl.program_id(0)
    D = h_sc.shape[1]

    @pl.when(t == 0)
    def _():
        # state=None in the reference forward -> zero initial LSTM state.
        h_sc[...] = jnp.zeros_like(h_sc)
        c_sc[...] = jnp.zeros_like(c_sc)

    x = x_ref[...]                                                        # (B, D)
    h_prev = h_sc[...]
    c_prev = c_sc[...]

    # Fused LSTMCell gates: [x, h_prev] @ [W_ih; W_hh] + b, done with
    # row-split weights (no lane concat).  Gate order i, f, g, o (PyTorch).
    lw = lstm_w_ref[...]                                                  # (2D, 4D)
    gates = (jnp.dot(x, lw[:D, :], preferred_element_type=jnp.float32)
             + jnp.dot(h_prev, lw[D:, :], preferred_element_type=jnp.float32)
             + lstm_b_ref[...])                                           # (B, 4D)
    i_g = jax.nn.sigmoid(gates[:, :D])
    f_g = jax.nn.sigmoid(gates[:, D:2 * D])
    g_g = jnp.tanh(gates[:, 2 * D:3 * D])
    o_g = jax.nn.sigmoid(gates[:, 3 * D:])
    c_new = f_g * c_prev + i_g * g_g
    h_new = o_g * jnp.tanh(c_new)
    h_sc[...] = h_new
    c_sc[...] = c_new

    # Vocab head (padded to 128 lanes -> unmasked full-lane store).
    out_ref[...] = (jnp.dot(h_new, wo_ref[...],
                            preferred_element_type=jnp.float32)
                    + bo_ref[...])                                        # (B, VPAD)


# --------------------------- pallas_call wrappers ----------------------------

def encode(images, params):
    """Backbone stand-in (patchify conv, folded with avgpool + encoder_layer)."""
    B, C, H, W = images.shape
    k = PATCH
    Ho, Wo = H // k, W // k
    N = Ho * Wo
    P = C * k * k
    D = INPLANES
    patches = (images.reshape(B, C, Ho, k, Wo, k)
                     .transpose(0, 2, 4, 1, 3, 5)
                     .reshape(B, N, P))
    return pl.pallas_call(
        _encoder_kernel,
        out_shape=jax.ShapeDtypeStruct((B, D), jnp.float32),
        grid=(1,),
        in_specs=[pl.BlockSpec((B, N, P), lambda i: (0, 0, 0)),
                  pl.BlockSpec((P, D), lambda i: (0, 0)),
                  pl.BlockSpec((1, D), lambda i: (0, 0))],
        out_specs=pl.BlockSpec((B, D), lambda i: (0, 0)),
        compiler_params=pltpu.CompilerParams(
            dimension_semantics=("arbitrary",)),
    )(patches, params['enc_w'], params['enc_b'])


def decode(img_feat, labels, d):
    """Whole teacher-forced decode loop in one pallas_call (grid over tokens)."""
    B, D = img_feat.shape
    T = labels.shape[1]
    VPAD = d['wo'].shape[1]

    # Step 0 input is the encoded image; step j>0 input is the (folded)
    # embedding of labels[:, j-1] (teacher forcing, as in the reference loop).
    emb_tok = jnp.take(d['embed_c'], labels.T, axis=0)                    # (T, B, D)
    x_seq = jnp.concatenate([img_feat[None], emb_tok[:T - 1]], axis=0)    # (T, B, D)

    step_flops = 2 * B * (2 * D * 4 * D + D * VPAD)
    flops = T * step_flops
    transcendentals = T * B * 5 * D
    w_bytes = 4 * sum(int(d[k].size) for k in ('lstm_w', 'lstm_b', 'wo', 'bo'))
    bytes_accessed = 4 * (T * B * D + T * B * VPAD) + w_bytes

    out = pl.pallas_call(
        _decoder_kernel,
        out_shape=jax.ShapeDtypeStruct((T, B, VPAD), jnp.float32),
        grid=(T,),
        in_specs=[pl.BlockSpec((None, B, D), lambda t: (t, 0, 0)),        # x_t
                  pl.BlockSpec((2 * D, 4 * D), lambda t: (0, 0)),         # lstm_w
                  pl.BlockSpec((1, 4 * D), lambda t: (0, 0)),             # lstm_b
                  pl.BlockSpec((D, VPAD), lambda t: (0, 0)),              # wo
                  pl.BlockSpec((1, VPAD), lambda t: (0, 0))],             # bo
        out_specs=pl.BlockSpec((None, B, VPAD), lambda t: (t, 0, 0)),
        scratch_shapes=[pltpu.VMEM((B, D), jnp.float32),                  # h
                        pltpu.VMEM((B, D), jnp.float32)],                 # c
        compiler_params=pltpu.CompilerParams(
            dimension_semantics=("arbitrary",)),
        cost_estimate=pl.CostEstimate(flops=int(flops),
                                      transcendentals=int(transcendentals),
                                      bytes_accessed=int(bytes_accessed)),
    )(x_seq, d['lstm_w'], d['lstm_b'], d['wo'], d['bo'])
    logits = out[:, :, :VOCAB]                                            # strip pad
    return jnp.transpose(logits, (1, 2, 0))                               # (B, V, T)


# --------------------------- parameter init ---------------------------------

def _dense(key, k_in, k_out, scale=0.02):
    kw, _ = jax.random.split(key)
    return (scale * jax.random.normal(kw, (k_in, k_out), jnp.float32),
            jnp.zeros((k_out,), jnp.float32))


def init_params(key):
    keys = iter(jax.random.split(key, 8))
    p = {}
    # TODO(synk): pretrained resnet50 backbone replaced by a linear 4x4 /
    # stride-4 patchify conv stand-in (3 -> 2048); loading torchvision .pth
    # weights is out of scope.
    bw, bb = _dense(next(keys), 3 * PATCH * PATCH, BACKBONE_C)
    ew, eb = _dense(next(keys), BACKBONE_C, INPLANES)                     # encoder_layer
    # Fold patchify @ avgpool @ encoder_layer offline (exact, all linear).
    p['enc_w'] = jnp.dot(bw, ew)                                          # (48, D)
    p['enc_b'] = jnp.dot(bb[None, :], ew) + eb[None, :]                   # (1, D)

    d = {}
    we = 0.02 * jax.random.normal(next(keys), (VOCAB, EMBED_D), jnp.float32)
    cw, cb = _dense(next(keys), EMBED_D, INPLANES)                        # word_compresser
    # Fold word_encoder @ word_compresser into one (V, D) lookup table.
    d['embed_c'] = jnp.dot(we, cw) + cb[None, :]                          # (V, D)

    w_ih, b_ih = _dense(next(keys), INPLANES, 4 * INPLANES)               # LSTMCell
    w_hh, b_hh = _dense(next(keys), INPLANES, 4 * INPLANES)
    d['lstm_w'] = jnp.concatenate([w_ih, w_hh], axis=0)                   # (2D, 4D)
    d['lstm_b'] = (b_ih + b_hh)[None, :]                                  # (1, 4D)

    ow, ob = _dense(next(keys), INPLANES, VOCAB)                          # out_layer
    d['wo'] = jnp.pad(ow, ((0, 0), (0, VOCAB_PAD - VOCAB)))               # (D, 128)
    d['bo'] = jnp.pad(ob, (0, VOCAB_PAD - VOCAB))[None, :]                # (1, 128)
    p['decoder'] = d
    return p


# --------------------------- forward -----------------------------------------

def lstm_captioner_forward(images, labels, params):
    # TODO(synk): the reference forward's CUDA/device bookkeeping and the
    # label_lens-driven shrinking of the batch (dropping finished captions)
    # have no clean static-shape Pallas equivalent; full-batch teacher forcing
    # over all T label positions is used instead.
    img_feat = encode(images, params)                     # (B, D)
    outputs = decode(img_feat, labels, params['decoder'])  # (B, V, T)
    return outputs


# --------------------------------- main --------------------------------------

if __name__ == "__main__":
    key = jax.random.PRNGKey(0)
    kp, ki, kl = jax.random.split(key, 3)
    params = init_params(kp)
    images = jax.random.normal(ki, (2, 3, 16, 16), jnp.float32)           # NCHW
    labels = jax.random.randint(kl, (2, 3), 0, VOCAB, jnp.int32)

    fwd = jax.jit(lstm_captioner_forward)
    out = fwd(images, labels, params)
    jax.block_until_ready(out)
    assert out.shape == (2, VOCAB, labels.shape[1]), out.shape
    assert bool(jnp.all(jnp.isfinite(out))), "non-finite logits"
    print("KERNEL_OK")
</pallas_src>

<mosaic_0001>
module attributes {stable_mosaic.version = 11 : i64} {
  func.func @_encoder_kernel(%arg0: i32, %arg1: memref<2x16x48xf32, #tpu.memory_space<vmem>>, %arg2: memref<48x32xf32, #tpu.memory_space<vmem>>, %arg3: memref<1x32xf32, #tpu.memory_space<vmem>>, %arg4: memref<2x32xf32, #tpu.memory_space<vmem>>) attributes {dimension_semantics = [#tpu.dimension_semantics<arbitrary>], iteration_bounds = array<i64: 1>, scalar_prefetch = 0 : i64, scratch_operands = 0 : i64, tpu.core_type = #tpu.core_type<tc>, window_params = [{pipeline_mode = #tpu.pipeline_mode<synchronous>, transform_indices = @transform_0, window_bounds = array<i64: 2, 16, 48>}, {pipeline_mode = #tpu.pipeline_mode<synchronous>, transform_indices = @transform_1, window_bounds = array<i64: 48, 32>}, {pipeline_mode = #tpu.pipeline_mode<synchronous>, transform_indices = @transform_2, window_bounds = array<i64: 1, 32>}, {pipeline_mode = #tpu.pipeline_mode<synchronous>, transform_indices = @transform_3, window_bounds = array<i64: 2, 32>}]} {
    %c0 = arith.constant 0 : index
    %c0_0 = arith.constant 0 : index
    %c0_1 = arith.constant 0 : index
    %0 = vector.load %arg1[%c0, %c0_0, %c0_1] : memref<2x16x48xf32, #tpu.memory_space<vmem>>, vector<2x16x48xf32>
    %cst = arith.constant dense<0.000000e+00> : vector<2x48xf32>
    %1 = vector.multi_reduction <add>, %0, %cst [1] : vector<2x16x48xf32> to vector<2x48xf32>
    %cst_2 = arith.constant 1.600000e+01 : f32
    %2 = vector.broadcast %cst_2 : f32 to vector<2x48xf32>
    %3 = arith.divf %1, %2 : vector<2x48xf32>
    %c0_3 = arith.constant 0 : index
    %c0_4 = arith.constant 0 : index
    %4 = vector.load %arg2[%c0_3, %c0_4] : memref<48x32xf32, #tpu.memory_space<vmem>>, vector<48x32xf32>
    %cst_5 = arith.constant dense<0.000000e+00> : vector<2x32xf32>
    %5 = tpu.matmul %3, %4, %cst_5 {dimension_numbers = #tpu.dot_dimension_numbers<[1], [0], [0], [1], [0, 0, 1, 1], [], []>} : vector<2x48xf32>, vector<48x32xf32>, vector<2x32xf32> -> vector<2x32xf32>
    %c0_6 = arith.constant 0 : index
    %c0_7 = arith.constant 0 : index
    %6 = vector.load %arg3[%c0_6, %c0_7] : memref<1x32xf32, #tpu.memory_space<vmem>>, vector<1x32xf32>
    %7 = vector.broadcast %6 : vector<1x32xf32> to vector<2x32xf32>
    %8 = arith.addf %5, %7 : vector<2x32xf32>
    %c0_8 = arith.constant 0 : index
    %c0_9 = arith.constant 0 : index
    %9 = vector.load %arg4[%c0_8, %c0_9] : memref<2x32xf32, #tpu.memory_space<vmem>>, vector<2x32xf32>
    tpu.vector_store %arg4[%c0_8, %c0_9], %8 {strides = array<i32>} : memref<2x32xf32, #tpu.memory_space<vmem>>, vector<2x32xf32>,
    return
  }
  func.func @transform_0(%arg0: i32) -> (i32, i32, i32) {
    %c0_i32 = arith.constant 0 : i32
    %c0_i32_0 = arith.constant 0 : i32
    %c0_i32_1 = arith.constant 0 : i32
    %c0_i32_2 = arith.constant 0 : i32
    return %c0_i32, %c0_i32_0, %c0_i32_1 : i32, i32, i32
  }
  func.func @transform_1(%arg0: i32) -> (i32, i32) {
    %c0_i32 = arith.constant 0 : i32
    %c0_i32_0 = arith.constant 0 : i32
    %c0_i32_1 = arith.constant 0 : i32
    return %c0_i32, %c0_i32_0 : i32, i32
  }
  func.func @transform_2(%arg0: i32) -> (i32, i32) {
    %c0_i32 = arith.constant 0 : i32
    %c0_i32_0 = arith.constant 0 : i32
    %c0_i32_1 = arith.constant 0 : i32
    return %c0_i32, %c0_i32_0 : i32, i32
  }
  func.func @transform_3(%arg0: i32) -> (i32, i32) {
    %c0_i32 = arith.constant 0 : i32
    %c0_i32_0 = arith.constant 0 : i32
    %c0_i32_1 = arith.constant 0 : i32
    return %c0_i32, %c0_i32_0 : i32, i32
  }
}

module attributes {stable_mosaic.version = 11 : i64} {
  func.func @_decoder_kernel(%arg0: i32, %arg1: memref<1x2x32xf32, #tpu.memory_space<vmem>>, %arg2: memref<64x128xf32, #tpu.memory_space<vmem>>, %arg3: memref<1x128xf32, #tpu.memory_space<vmem>>, %arg4: memref<32x128xf32, #tpu.memory_space<vmem>>, %arg5: memref<1x128xf32, #tpu.memory_space<vmem>>, %arg6: memref<1x2x128xf32, #tpu.memory_space<vmem>>, %arg7: memref<2x32xf32, #tpu.memory_space<vmem>>, %arg8: memref<2x32xf32, #tpu.memory_space<vmem>>) attributes {dimension_semantics = [#tpu.dimension_semantics<arbitrary>], iteration_bounds = array<i64: 3>, scalar_prefetch = 0 : i64, scratch_operands = 2 : i64, tpu.core_type = #tpu.core_type<tc>, window_params = [{transform_indices = @transform_0, window_bounds = array<i64: 1, 2, 32>}, {pipeline_mode = #tpu.pipeline_mode<synchronous>, transform_indices = @transform_1, window_bounds = array<i64: 64, 128>}, {pipeline_mode = #tpu.pipeline_mode<synchronous>, transform_indices = @transform_2, window_bounds = array<i64: 1, 128>}, {pipeline_mode = #tpu.pipeline_mode<synchronous>, transform_indices = @transform_3, window_bounds = array<i64: 32, 128>}, {pipeline_mode = #tpu.pipeline_mode<synchronous>, transform_indices = @transform_4, window_bounds = array<i64: 1, 128>}, {transform_indices = @transform_5, window_bounds = array<i64: 1, 2, 128>}]} {
    %c0_i32 = arith.constant 0 : i32
    %0 = arith.cmpi eq, %arg0, %c0_i32 : i32
    %1 = arith.extui %0 : i1 to i32
    %c0_i32_0 = arith.constant 0 : i32
    %2 = arith.cmpi ne, %1, %c0_i32_0 : i32
    scf.if %2 {
      %cst_27 = arith.constant 0.000000e+00 : f32
      %51 = vector.broadcast %cst_27 : f32 to vector<2x32xf32>
      %c0_28 = arith.constant 0 : index
      %c0_29 = arith.constant 0 : index
      %52 = vector.load %arg7[%c0_28, %c0_29] : memref<2x32xf32, #tpu.memory_space<vmem>>, vector<2x32xf32>
      tpu.vector_store %arg7[%c0_28, %c0_29], %51 {strides = array<i32>} : memref<2x32xf32, #tpu.memory_space<vmem>>, vector<2x32xf32>,
      %cst_30 = arith.constant 0.000000e+00 : f32
      %53 = vector.broadcast %cst_30 : f32 to vector<2x32xf32>
      %c0_31 = arith.constant 0 : index
      %c0_32 = arith.constant 0 : index
      %54 = vector.load %arg8[%c0_31, %c0_32] : memref<2x32xf32, #tpu.memory_space<vmem>>, vector<2x32xf32>
      tpu.vector_store %arg8[%c0_31, %c0_32], %53 {strides = array<i32>} : memref<2x32xf32, #tpu.memory_space<vmem>>, vector<2x32xf32>,
    } else {
    }
    %c0 = arith.constant 0 : index
    %c0_1 = arith.constant 0 : index
    %c0_2 = arith.constant 0 : index
    %3 = vector.load %arg1[%c0, %c0_1, %c0_2] : memref<1x2x32xf32, #tpu.memory_space<vmem>>, vector<1x2x32xf32>
    %4 = vector.shape_cast %3 : vector<1x2x32xf32> to vector<2x32xf32>
    %c0_3 = arith.constant 0 : index
    %c0_4 = arith.constant 0 : index
    %5 = vector.load %arg7[%c0_3, %c0_4] : memref<2x32xf32, #tpu.memory_space<vmem>>, vector<2x32xf32>
    %c0_5 = arith.constant 0 : index
    %c0_6 = arith.constant 0 : index
    %6 = vector.load %arg8[%c0_5, %c0_6] : memref<2x32xf32, #tpu.memory_space<vmem>>, vector<2x32xf32>
    %c0_7 = arith.constant 0 : index
    %c0_8 = arith.constant 0 : index
    %7 = vector.load %arg2[%c0_7, %c0_8] : memref<64x128xf32, #tpu.memory_space<vmem>>, vector<64x128xf32>
    %8 = vector.extract_strided_slice %7 {offsets = [0, 0], sizes = [32, 128], strides = [1, 1]} : vector<64x128xf32> to vector<32x128xf32>
    %cst = arith.constant dense<0.000000e+00> : vector<2x128xf32>
    %9 = tpu.matmul %4, %8, %cst {dimension_numbers = #tpu.dot_dimension_numbers<[1], [0], [0], [1], [0, 0, 1, 1], [], []>} : vector<2x32xf32>, vector<32x128xf32>, vector<2x128xf32> -> vector<2x128xf32>
    %10 = vector.extract_strided_slice %7 {offsets = [32, 0], sizes = [32, 128], strides = [1, 1]} : vector<64x128xf32> to vector<32x128xf32>
    %cst_9 = arith.constant dense<0.000000e+00> : vector<2x128xf32>
    %11 = tpu.matmul %5, %10, %cst_9 {dimension_numbers = #tpu.dot_dimension_numbers<[1], [0], [0], [1], [0, 0, 1, 1], [], []>} : vector<2x32xf32>, vector<32x128xf32>, vector<2x128xf32> -> vector<2x128xf32>
    %12 = arith.addf %9, %11 : vector<2x128xf32>
    %c0_10 = arith.constant 0 : index
    %c0_11 = arith.constant 0 : index
    %13 = vector.load %arg3[%c0_10, %c0_11] : memref<1x128xf32, #tpu.memory_space<vmem>>, vector<1x128xf32>
    %14 = vector.broadcast %13 : vector<1x128xf32> to vector<2x128xf32>
    %15 = arith.addf %12, %14 : vector<2x128xf32>
    %16 = vector.extract_strided_slice %15 {offsets = [0, 0], sizes = [2, 32], strides = [1, 1]} : vector<2x128xf32> to vector<2x32xf32>
    %17 = arith.negf %16 : vector<2x32xf32>
    %18 = math.exp %17 : vector<2x32xf32>
    %cst_12 = arith.constant 1.000000e+00 : f32
    %19 = vector.broadcast %cst_12 : f32 to vector<2x32xf32>
    %20 = arith.addf %19, %18 : vector<2x32xf32>
    %21 = arith.divf %19, %20 : vector<2x32xf32>
    %22 = vector.extract_strided_slice %15 {offsets = [0, 32], sizes = [2, 32], strides = [1, 1]} : vector<2x128xf32> to vector<2x32xf32>
    %23 = arith.negf %22 : vector<2x32xf32>
    %24 = math.exp %23 : vector<2x32xf32>
    %cst_13 = arith.constant 1.000000e+00 : f32
    %25 = vector.broadcast %cst_13 : f32 to vector<2x32xf32>
    %26 = arith.addf %25, %24 : vector<2x32xf32>
    %27 = arith.divf %25, %26 : vector<2x32xf32>
    %28 = vector.extract_strided_slice %15 {offsets = [0, 64], sizes = [2, 32], strides = [1, 1]} : vector<2x128xf32> to vector<2x32xf32>
    %29 = math.tanh %28 : vector<2x32xf32>
    %30 = vector.extract_strided_slice %15 {offsets = [0, 96], sizes = [2, 32], strides = [1, 1]} : vector<2x128xf32> to vector<2x32xf32>
    %31 = arith.negf %30 : vector<2x32xf32>
    %32 = math.exp %31 : vector<2x32xf32>
    %cst_14 = arith.constant 1.000000e+00 : f32
    %33 = vector.broadcast %cst_14 : f32 to vector<2x32xf32>
    %34 = arith.addf %33, %32 : vector<2x32xf32>
    %35 = arith.divf %33, %34 : vector<2x32xf32>
    %36 = arith.mulf %27, %6 : vector<2x32xf32>
    %37 = arith.mulf %21, %29 : vector<2x32xf32>
    %38 = arith.addf %36, %37 : vector<2x32xf32>
    %39 = math.tanh %38 : vector<2x32xf32>
    %40 = arith.mulf %35, %39 : vector<2x32xf32>
    %c0_15 = arith.constant 0 : index
    %c0_16 = arith.constant 0 : index
    %41 = vector.load %arg7[%c0_15, %c0_16] : memref<2x32xf32, #tpu.memory_space<vmem>>, vector<2x32xf32>
    tpu.vector_store %arg7[%c0_15, %c0_16], %40 {strides = array<i32>} : memref<2x32xf32, #tpu.memory_space<vmem>>, vector<2x32xf32>,
    %c0_17 = arith.constant 0 : index
    %c0_18 = arith.constant 0 : index
    %42 = vector.load %arg8[%c0_17, %c0_18] : memref<2x32xf32, #tpu.memory_space<vmem>>, vector<2x32xf32>
    tpu.vector_store %arg8[%c0_17, %c0_18], %38 {strides = array<i32>} : memref<2x32xf32, #tpu.memory_space<vmem>>, vector<2x32xf32>,
    %c0_19 = arith.constant 0 : index
    %c0_20 = arith.constant 0 : index
    %43 = vector.load %arg4[%c0_19, %c0_20] : memref<32x128xf32, #tpu.memory_space<vmem>>, vector<32x128xf32>
    %cst_21 = arith.constant dense<0.000000e+00> : vector<2x128xf32>
    %44 = tpu.matmul %40, %43, %cst_21 {dimension_numbers = #tpu.dot_dimension_numbers<[1], [0], [0], [1], [0, 0, 1, 1], [], []>} : vector<2x32xf32>, vector<32x128xf32>, vector<2x128xf32> -> vector<2x128xf32>
    %c0_22 = arith.constant 0 : index
    %c0_23 = arith.constant 0 : index
    %45 = vector.load %arg5[%c0_22, %c0_23] : memref<1x128xf32, #tpu.memory_space<vmem>>, vector<1x128xf32>
    %46 = vector.broadcast %45 : vector<1x128xf32> to vector<2x128xf32>
    %47 = arith.addf %44, %46 : vector<2x128xf32>
    %c0_24 = arith.constant 0 : index
    %c0_25 = arith.constant 0 : index
    %c0_26 = arith.constant 0 : index
    %48 = vector.load %arg6[%c0_24, %c0_25, %c0_26] : memref<1x2x128xf32, #tpu.memory_space<vmem>>, vector<1x2x128xf32>
    %49 = vector.shape_cast %48 : vector<1x2x128xf32> to vector<2x128xf32>
    %50 = vector.shape_cast %47 : vector<2x128xf32> to vector<1x2x128xf32>
    tpu.vector_store %arg6[%c0_24, %c0_25, %c0_26], %50 {strides = array<i32>} : memref<1x2x128xf32, #tpu.memory_space<vmem>>, vector<1x2x128xf32>,
    return
  }
  func.func @transform_0(%arg0: i32) -> (i32, i32, i32) {
    %c0_i32 = arith.constant 0 : i32
    %c0_i32_0 = arith.constant 0 : i32
    %c0_i32_1 = arith.constant 0 : i32
    return %arg0, %c0_i32, %c0_i32_0 : i32, i32, i32
  }
  func.func @transform_1(%arg0: i32) -> (i32, i32) {
    %c0_i32 = arith.constant 0 : i32
    %c0_i32_0 = arith.constant 0 : i32
    %c0_i32_1 = arith.constant 0 : i32
    return %c0_i32, %c0_i32_0 : i32, i32
  }
  func.func @transform_2(%arg0: i32) -> (i32, i32) {
    %c0_i32 = arith.constant 0 : i32
    %c0_i32_0 = arith.constant 0 : i32
    %c0_i32_1 = arith.constant 0 : i32
    return %c0_i32, %c0_i32_0 : i32, i32
  }
  func.func @transform_3(%arg0: i32) -> (i32, i32) {
    %c0_i32 = arith.constant 0 : i32
    %c0_i32_0 = arith.constant 0 : i32
    %c0_i32_1 = arith.constant 0 : i32
    return %c0_i32, %c0_i32_0 : i32, i32
  }
  func.func @transform_4(%arg0: i32) -> (i32, i32) {
    %c0_i32 = arith.constant 0 : i32
    %c0_i32_0 = arith.constant 0 : i32
    %c0_i32_1 = arith.constant 0 : i32
    return %c0_i32, %c0_i32_0 : i32, i32
  }
  func.func @transform_5(%arg0: i32) -> (i32, i32, i32) {
    %c0_i32 = arith.constant 0 : i32
    %c0_i32_0 = arith.constant 0 : i32
    %c0_i32_1 = arith.constant 0 : i32
    return %arg0, %c0_i32, %c0_i32_0 : i32, i32, i32
  }
}

</mosaic_0001>

<bundles_post_ra>
// kernel: lstm_captioner_forward.3
= control target key start
LH: loop header
LB: loop body
LE: loop exit
PB: predicated region body
PF: predicated region fallthrough
CT: control target
= control target key end

     0   :  { %s719_s18 = smov 0   ;;  %s799_s0 = inlined_call_operand.vmem [shape: f32[3,2,32], index: 0, kind: input, shape index: {}]   ;;  %s800_s1 = inlined_call_operand.vmem [shape: f32[64,128], index: 1, kind: input, shape index: {}]   ;;  %s801_s2 = inlined_call_operand.vmem [shape: f32[1,128], index: 2, kind: input, shape index: {}]   ;;  %s802_s3 = inlined_call_operand.vmem [shape: f32[32,128], index: 3, kind: input, shape index: {}]   ;;  %s803_s4 = inlined_call_operand.vmem [shape: f32[1,128], index: 4, kind: input, shape index: {}]   ;;  %s804_s5 = inlined_call_operand.vmem [shape: f32[3,2,128], index: 5, kind: output, shape index: {}]  }
   0x1 LB: > { %s569_s19 = sadd.s32 4294967295, %s680_s18   ;;  %p573_p0 = scmp.ge.s32.totalorder %s680_s18, 1  ;;  %s680_s18 = sphi %s719_s18, %s15_s18  }
   0x2   : > { %p186_p1 = scmp.lt.s32.totalorder %s680_s18, 4 }
   0x4   : > { %p187_p2 = pnand %p573_p0, %p186_p1 }
   0x5   : > { %p212_p3 = scmp.lt.s32.totalorder (!%p187_p2), %s569_s19, 2  ;;  %p576_p4 = scmp.ne.s32.totalorder (!%p187_p2), %s569_s19, 0 }
   0x6   : > { %190 = sbr.rel (%p187_p2) target bundleno = 951 (0x3b7), region = 40 }
   0xd   : > { %s213_s20 = scalar_select %p212_p3, %s569_s19, 2 }
   0xe   : > { %223 = sbr.rel (%p576_p4) target bundleno = 21 (0x15), region = 44  ;;  %vm224_vm0 = vcmask (!%p576_p4), 254976   ;;  %v682_v0 = vmov (!%p576_p4), 0.0  }
   0xf   : > { %s574_s21 = sshll.u32 %s213_s20, 1  ;;  %225 = vst.msk [vmem:[#allocation2] sm:$0x3] (!%p576_p4), %vm224_vm0, %v682_v0  ;;  %226 = vst.msk [vmem:[#allocation3] sm:$0x3] (!%p576_p4), %vm224_vm0, %v682_v0 }
  0x10   : > { %s730_s24 = scalar_lea.vmem %s799_s0, %s574_s21  ;;  %s735_s27 = scalar_lea.vmem %s804_s5, %s574_s21 }
  0x15 PF: > { %v234_v1 = vld [vmem:[%s800_s1 + $0x20] sm:$0xff]  ;;  %v235_v2 = vld [vmem:[%s800_s1 + $0x28] sm:$0xff]  ;;  %v683_v4 = vmov 0.0|0.0   ;;  %v236_v7 = vld [vmem:[%s800_s1 + $0x30] sm:$0xff]  ;;  %vm684_vm1 = vmmov 0   ;;  %v685_v12 = vmov 0.0  }
  0x16   : > { %v230_v3 = vld [vmem:[%s800_s1] sm:$0xff]  ;;  %633 = vmatprep.subr.bf16.mxu0 %v683_v4  ;;  %639 = vmatprep.subr.bf16.mxu1 %v683_v4  ;;  %v634_v5 = vpack.c.bf16 %v235_v2, %v234_v1  ;;  %v231_v6 = vld [vmem:[%s800_s1 + $0x8] sm:$0xff]  ;;  %v237_v8 = vld [vmem:[%s800_s1 + $0x38] sm:$0xff]  ;;  %vm238_vm2 = vcmask 261120   ;;  %s686_s22 = smov 64   ;;  %s687_s23 = smov 32  }
  0x17   : > { %v640_v9 = vpack.c.bf16 %v231_v6, %v230_v3  ;;  %v232_v10 = vld [vmem:[%s800_s1 + $0x10] sm:$0xff]  ;;  %v233_v11 = vld [vmem:[%s800_s1 + $0x18] sm:$0xff]  ;;  %608 = vmatprep.mubr.msk.f32.mxu0 %vm684_vm1, %v685_v12  ;;  %619 = vmatprep.mubr.msk.f32.mxu1 %vm684_vm1, %v685_v12  ;;  %v637_v13 = vpack.c.bf16 %v237_v8, %v236_v7  ;;  %v228_v15 = vld [vmem:[#allocation2] sm:$0x3]  ;;  %s688_s8 = smov 96   ;;  %vm425_vm3 = vcmask 254976  }
  0x18   : > { %635 = vmatpush3.bf16.msra.mxu0 %v634_v5  ;;  %v643_v14 = vpack.c.bf16 %v233_v11, %v232_v10  ;;  %v227_v16 = vld [vmem:[%s730_s24] sm:$0x3]  ;;  %v229_v25 = vld [vmem:[#allocation3] sm:$0x3]  ;;  %v433_v37 = vld [vmem:[%s802_s3 + $0x8] sm:$0xff] }
  0x19   : > { %641 = vmatpush3.bf16.msra.mxu1 %v640_v9  ;;  %636 = vmatprep.subr.bf16.mxu0 %v683_v4  ;;  %v579_v19 = vld [vmem:[%s801_s2] ss:$0 sm:$0xff]  ;;  %v434_v38 = vld [vmem:[%s802_s3 + $0x10] sm:$0xff]  ;;  %v435_v40 = vld [vmem:[%s802_s3 + $0x18] sm:$0xff] }
  0x1a   : > { %642 = vmatprep.subr.bf16.mxu1 %v683_v4  ;;  %v432_v36 = vld [vmem:[%s802_s3] sm:$0xff]  ;;  %v649_v41 = vpack.c.bf16 %v435_v40, %v434_v38 }
  0x1b   : > { %v646_v39 = vpack.c.bf16 %v433_v37, %v432_v36  ;;  %v581_v47 = vld [vmem:[%s803_s4] ss:$0 sm:$0xff] }
  0x1c   : > { %638 = vmatpush3.bf16.msra.mxu0 %v637_v13 }
  0x1d   : > { %644 = vmatpush3.bf16.msra.mxu1 %v643_v14  ;;  %645 = vmatprep.subr.bf16.mxu0 %v683_v4 }
  0x1f   : > { %609 = vmatmul.mubr.msk.f32.vlgmr.msra.gmra.mrb[0].mxu0 %vm238_vm2, %v228_v15 }
  0x20   : > { %620 = vmatmul.mubr.msk.f32.vlgmr.msra.gmra.mrb[0].mxu1 %vm238_vm2, %v227_v16  ;;  %630 = vmatprep.mubr.msk.f32.mxu0 %vm684_vm1, %v685_v12 }
  0x21   : > { %647 = vmatpush3.bf16.msra.mxu0 %v646_v39 }
  0x22   : > { %648 = vmatprep.subr.bf16.mxu0 %v683_v4 }
  0x25   : > { %650 = vmatpush3.bf16.msra.mxu0 %v649_v41 }
  0xf2   : > { %v308_v17 = vpop.f32.mrb[0].mxu0 }
  0xf3   : > { %v381_v18 = vpop.f32.mrb[0].mxu1  ;;  %v610_v20 = vpop.f32.mrb[1].mxu0 }
  0xf4   : > { %v382_v21 = vadd.f32 %v381_v18, %v308_v17  ;;  %v621_v22 = vpop.f32.mrb[1].mxu1 }
  0xf6   : > { %v392_v23 = vadd.f32 %v579_v19, %v382_v21 }
  0xf8   : > { %666 = vtanh.f32 %v392_v23  ;;  %v580_v26 = vmul.f32 -1.442695, %v392_v23 }
  0xfa   : > { %668 = vpow2.f32 %v580_v26 }
 0x102   : > { %v667_v24 = vpop.eup %666 }
 0x103   : > { %406 = vrot.lane.b32.xlu0 %v667_v24, %s686_s22 }
 0x104   : > { %v669_v27 = vpop.eup %668 }
 0x105   : > { %v396_v28 = vadd.f32 1.0, %v669_v27 }
 0x107   : > { %401 = vrot.lane.b32.xlu0 %v229_v25, %s687_s23  ;;  %670 = vrcp.f32 %v396_v28 }
 0x111   : > { %v671_v29 = vpop.eup %670 }
 0x175   : > { %v407_v30 = vpop.permute.xlu0 %406 }
 0x176   : > { %v409_v31 = vmul.f32 %v671_v29, %v407_v30 }
 0x178   : > { %411 = vrot.lane.b32.xlu1 %v409_v31, %s687_s23 }
 0x179   : > { %v402_v32 = vpop.permute.xlu0 %401 }
 0x17a   : > { %v404_v33 = vmul.f32 %v671_v29, %v402_v32 }
 0x1ea   : > { %v412_v34 = vpop.permute.xlu1 %411 }
 0x1eb   : > { %v414_v35 = vadd.f32 %v412_v34, %v404_v33 }
 0x1ed   : > { %672 = vtanh.f32 %v414_v35 }
 0x1f7   : > { %v673_v42 = vpop.eup %672 }
 0x1f8   : > { %417 = vrot.lane.b32.xlu1 %v673_v42, %s686_s22 }
 0x1fc   : > { %428 = vrot.lane.b32.xlu1 %v414_v35, %s688_s8 }
 0x26a   : > { %v418_v43 = vpop.permute.xlu1 %417 }
 0x26b   : > { %v420_v44 = vmul.f32 %v671_v29, %v418_v43 }
 0x26d   : > { %422 = vrot.lane.b32.xlu0 %v420_v44, %s687_s23 }
 0x26e   : > { %v429_v45 = vpop.permute.xlu1 %428 }
 0x26f   : > { %431 = vst.msk [vmem:[#allocation3] sm:$0x3] %vm425_vm3, %v429_v45 }
 0x2df   : > { %v423_v46 = vpop.permute.xlu0 %422 }
 0x2e0   : > { %426 = vst.msk [vmem:[#allocation2] sm:$0x3] %vm425_vm3, %v423_v46  ;;  %631 = vmatmul.mubr.msk.f32.vlgmr.msra.gmra.mrb[2].mxu0 %vm238_vm2, %v423_v46 }
 0x3b3   : > { %v511_v48 = vpop.f32.mrb[2].mxu0 }
 0x3b4   : > { %v512_v49 = vadd.f32 %v581_v47, %v511_v48  ;;  %v632_v50 = vpop.f32.mrb[3].mxu0 }
 0x3b6   : > { %515 = vst [vmem:[%s735_s27] sm:$0x3] %v512_v49 }
 0x3b7 PF: > { %s15_s18 = sadd.s32 1, %s680_s18  }
 0x3b8   : > { %p12_p5 = scmp.ge.s32.totalorder %s15_s18, 5  }
 0x3ba   :  { %14 = sbr.rel (!%p12_p5) target bundleno = 1 (0x1), region = 74 }

// kernel: lstm_captioner_forward.2
= control target key start
LH: loop header
LB: loop body
LE: loop exit
PB: predicated region body
PF: predicated region fallthrough
CT: control target
= control target key end

     0   :  { %v171_v0 = vmov 0.0|0.0   ;;  %vm172_vm0 = vmmov 0   ;;  %v173_v4 = vmov 0.0   ;;  %vm18_vm1 = vcmask 392192   ;;  %s235_s1 = inlined_call_operand.vmem [shape: f32[48,32], index: 1, kind: input, shape index: {}]   ;;  %s236_s0 = inlined_call_operand.vmem [shape: f32[2,16,48], index: 0, kind: input, shape index: {}]   ;;  %s237_s2 = inlined_call_operand.vmem [shape: f32[1,32], index: 2, kind: input, shape index: {}]   ;;  %s238_s3 = inlined_call_operand.vmem [shape: f32[2,32], index: 3, kind: output, shape index: {}]  }
   0x1   :  { %159 = vmatprep.subr.bf16.mxu0 %v171_v0  ;;  %v40_v1 = vld [vmem:[%s235_s1] sm:$0xff]  ;;  %v41_v2 = vld [vmem:[%s235_s1 + $0x8] sm:$0xff]  ;;  %v42_v3 = vld [vmem:[%s235_s1 + $0x10] sm:$0xff]  ;;  %156 = vmatprep.mubr.msk.f32.mxu0 %vm172_vm0, %v173_v4  ;;  %vm55_vm2 = vcmask 1041409   ;;  %vm129_vm3 = vcmask 254976  }
   0x2   :  { %v160_v5 = vpack.c.bf16 %v41_v2, %v40_v1  ;;  %v43_v6 = vld [vmem:[%s235_s1 + $0x18] sm:$0xff]  ;;  %v14_v7 = vld [vmem:[%s236_s0] sm:$0xff]  ;;  %v15_v8 = vld [vmem:[%s236_s0 + $0x8] sm:$0xff] }
   0x3   :  { %v16_v9 = vld [vmem:[%s236_s0 + $0x10] sm:$0xff]  ;;  %v163_v10 = vpack.c.bf16 %v43_v6, %v42_v3  ;;  %v17_v11 = vld [vmem:[%s236_s0 + $0x18] sm:$0xff]  ;;  %v19_v12 = vsel %vm18_vm1, %v14_v7, 0.0  ;;  %v20_v13 = vsel %vm18_vm1, %v15_v8, 0.0  ;;  %v44_v15 = vld [vmem:[%s235_s1 + $0x20] sm:$0xff] }
   0x4   :  { %161 = vmatpush3.bf16.msra.mxu0 %v160_v5  ;;  %v28_v14 = vsel %vm18_vm1, %v16_v9, 0.0  ;;  %v45_v16 = vld [vmem:[%s235_s1 + $0x28] sm:$0xff]  ;;  %v21_v17 = vadd.f32 %v20_v13, %v19_v12  ;;  %v29_v18 = vsel %vm18_vm1, %v17_v11, 0.0  ;;  %v135_v36 = vld [vmem:[%s237_s2] ss:$0 sm:$0xff] }
   0x5   :  { %162 = vmatprep.subr.bf16.mxu0 %v171_v0  ;;  %v30_v19 = vadd.f32 %v29_v18, %v28_v14  ;;  %v166_v21 = vpack.c.bf16 %v45_v16, %v44_v15 }
   0x6   :  { %v22_v20 = vrot.slane %v21_v17, 4 }
   0x7   :  { %v31_v22 = vrot.slane %v30_v19, 4 }
   0x8   :  { %164 = vmatpush3.bf16.msra.mxu0 %v163_v10  ;;  %v23_v23 = vadd.f32 %v22_v20, %v21_v17 }
   0x9   :  { %165 = vmatprep.subr.bf16.mxu0 %v171_v0  ;;  %v32_v24 = vadd.f32 %v31_v22, %v30_v19 }
   0xa   :  { %v24_v25 = vrot.slane %v23_v23, 2 }
   0xb   :  { %v33_v26 = vrot.slane %v32_v24, 2 }
   0xc   :  { %167 = vmatpush3.bf16.msra.mxu0 %v166_v21  ;;  %v25_v27 = vadd.f32 %v24_v25, %v23_v23 }
   0xd   :  { %v34_v28 = vadd.f32 %v33_v26, %v32_v24 }
   0xe   :  { %v26_v29 = vrot.slane %v25_v27, 1 }
   0xf   :  { %v35_v30 = vrot.slane %v34_v28, 1 }
  0x10   :  { %v27_v31 = vadd.f32 %v26_v29, %v25_v27 }
  0x11   :  { %v36_v32 = vadd.f32 %v35_v30, %v34_v28 }
  0x12   :  { %v38_v33 = vmul.f32 0.0625, %v27_v31 }
  0x13   :  { %v39_v34 = vmul.f32 0.0625, %v36_v32 }
  0x15   :  { %v56_v35 = vsel %vm55_vm2, %v39_v34, %v38_v33 }
  0x16   :  { %157 = vmatmul.mubr.msk.f32.vlgmr.msra.gmra.mrb[0].mxu0 %vm18_vm1, %v56_v35 }
  0xe9   :  { %v125_v37 = vpop.f32.mrb[0].mxu0 }
  0xea   :  { %v126_v38 = vadd.f32 %v135_v36, %v125_v37  ;;  %v158_v39 = vpop.f32.mrb[1].mxu0 }
  0xec   :  { %130 = vst.msk [vmem:[%s238_s3] sm:$0x3] %vm129_vm3, %v126_v38 }

</bundles_post_ra>
